<compile_context>
chip_gen: v7x
topology: tpu7x:2x2x1
jax: 0.10.0
libtpu: 0.0.40
codegen_flags: <defaults>
</compile_context>

<pallas_src>
import math

import jax
import jax.numpy as jnp
from jax.experimental import pallas as pl
from jax.experimental.pallas import tpu as pltpu

# ----------------------------- configuration --------------------------------
VOCAB_SIZES = [9, 24, 15, 5, 10, 2, 3, 6, 1, 6, 6, 50, 37, 8, 9, 8, 9, 3, 3, 5,
               40, 40, 41, 5, 3]
N_EMB = len(VOCAB_SIZES)                    # 25
EMB_DIM = 4
X_C_DIM = 28                                # continuous features
FEATURE_DIM = N_EMB * EMB_DIM + X_C_DIM     # 100 + 28 = 128
EXPERT_DIM = 8
N_EXPERT = 4
N_TASK = 2
EXPERT_HIDDEN = (16, 8)                     # expert_hidden_layers
TOWER_HIDDEN = (8, 4)                       # hidden_layer1
BATCH = 8
TILE_B = 8                                  # raise to 128-512 for real batches
LANES = 128                                 # lane-dense pad width

_offsets, _acc = [], 0
for _v in VOCAB_SIZES:
    _offsets.append(_acc)
    _acc += _v
EMB_OFFSETS = tuple(_offsets)               # per-column offset into combined table
TOTAL_VOCAB = _acc                          # 348

# Fused ("concat" / block-diagonal) layer widths.
D_H1 = N_EXPERT * EXPERT_HIDDEN[0]          # 64
D_GATE = N_TASK * N_EXPERT                  # 8
D_H2 = N_EXPERT * EXPERT_HIDDEN[1]          # 32
D_H3 = N_EXPERT * EXPERT_DIM                # 32
D_T1 = N_TASK * TOWER_HIDDEN[0]             # 16
D_T2 = N_TASK * TOWER_HIDDEN[1]             # 8

# ----------------------- packed weight-blob layout ---------------------------
# Every weight segment starts on a multiple-of-8 row; K of every matmul operand
# is an exact multiple of 8. Biases are single rows at the end.
R_W1 = 0                                    # [128, 128]  ew1 (0:64) | gw (64:72), rest 0
R_EW2 = R_W1 + FEATURE_DIM                  # 128: [64, 32]
R_EW3 = R_EW2 + D_H1                        # 192: [32, 32]
R_TW1 = R_EW3 + D_H2                        # 224: [16, 16]
R_TW2 = R_TW1 + D_T1                        # 240: [16, 8]
R_TW3 = R_TW2 + D_T1                        # 256: [8, 128]  (cols 0:2 real, rest 0)
R_B1 = R_TW3 + D_T2                         # 264: bias row for layer1+gates (72 wide)
R_EB2 = R_B1 + 1                            # 265
R_EB3 = R_EB2 + 1                           # 266
R_TB1 = R_EB3 + 1                           # 267
R_TB2 = R_TB1 + 1                           # 268
R_TB3 = R_TB2 + 1                           # 269
BLOB_ROWS = 272                             # padded to a multiple of 8


# ------------------------------- kernel --------------------------------------
def mmoe_kernel(x_ref, w_ref, out_ref):
    """Fully fused MMoE dense path for one batch tile (6 matmuls total)."""
    x = x_ref[...]                                               # [TB, 128]

    # ---- expert layer 1 + BOTH gates in ONE lane-padded matmul ----
    y1 = jnp.dot(x, w_ref[R_W1:R_W1 + FEATURE_DIM, :],
                 preferred_element_type=jnp.float32)
    y1 = y1 + w_ref[R_B1:R_B1 + 1, :]                            # [TB, 128]
    h = jnp.maximum(y1[:, 0:D_H1], 0.0)                          # [TB, 64]
    glog = y1[:, D_H1:D_H1 + D_GATE]                             # [TB, 8]

    # ---- expert layers 2 & 3 (block-diagonal over experts) ----
    h = jnp.maximum(
        jnp.dot(h, w_ref[R_EW2:R_EW2 + D_H1, 0:D_H2],
                preferred_element_type=jnp.float32)
        + w_ref[R_EB2:R_EB2 + 1, 0:D_H2], 0.0)                   # [TB, 32]
    h = jnp.maximum(
        jnp.dot(h, w_ref[R_EW3:R_EW3 + D_H2, 0:D_H3],
                preferred_element_type=jnp.float32)
        + w_ref[R_EB3:R_EB3 + 1, 0:D_H3], 0.0)                   # [TB, 32]

    # ---- per-task softmax gate + expert mixing ----
    exp_blocks = [h[:, e * EXPERT_DIM:(e + 1) * EXPERT_DIM] for e in range(N_EXPERT)]
    mixes = []
    for t in range(N_TASK):
        lg = glog[:, t * N_EXPERT:(t + 1) * N_EXPERT]            # [TB, 4]
        lg = lg - jnp.max(lg, axis=-1, keepdims=True)
        p = jnp.exp(lg)
        inv = pl.reciprocal(jnp.sum(p, axis=-1, keepdims=True), approx=True)
        g = p * inv                                              # [TB, 4]
        mix = g[:, 0:1] * exp_blocks[0]
        for e in range(1, N_EXPERT):
            mix = mix + g[:, e:e + 1] * exp_blocks[e]
        mixes.append(mix)                                        # [TB, 8]
    m = jnp.concatenate(mixes, axis=-1)                          # [TB, 16]

    # ---- towers (block-diagonal over tasks) ----
    t1 = jnp.maximum(
        jnp.dot(m, w_ref[R_TW1:R_TW1 + D_T1, 0:D_T1],
                preferred_element_type=jnp.float32)
        + w_ref[R_TB1:R_TB1 + 1, 0:D_T1], 0.0)                   # [TB, 16]
    t2 = jnp.maximum(
        jnp.dot(t1, w_ref[R_TW2:R_TW2 + D_T1, 0:D_T2],
                preferred_element_type=jnp.float32)
        + w_ref[R_TB2:R_TB2 + 1, 0:D_T2], 0.0)                   # [TB, 8]

    # ---- final task logits, lane-padded to 128 -> unmasked full-tile store ----
    logit = jnp.dot(t2, w_ref[R_TW3:R_TW3 + D_T2, :],
                    preferred_element_type=jnp.float32)
    logit = logit + w_ref[R_TB3:R_TB3 + 1, :]                    # [TB, 128]
    out_ref[...] = jax.nn.sigmoid(logit)                         # lanes >=2 ignored


# ------------------------------ wrapper ---------------------------------------
def _dense_pallas(x, wblob):
    b = x.shape[0]
    grid = (pl.cdiv(b, TILE_B),)
    flops = 2 * b * (FEATURE_DIM * LANES + D_H1 * D_H2 + D_H2 * D_H3
                     + D_T1 * D_T1 + D_T1 * D_T2 + D_T2 * LANES)
    bytes_accessed = 4 * (b * FEATURE_DIM + BLOB_ROWS * LANES + b * LANES)
    return pl.pallas_call(
        mmoe_kernel,
        out_shape=jax.ShapeDtypeStruct((b, LANES), jnp.float32),
        grid=grid,
        in_specs=[
            pl.BlockSpec((TILE_B, FEATURE_DIM), lambda i: (i, 0)),
            # Weight blob stays resident across batch tiles.
            pl.BlockSpec((BLOB_ROWS, LANES), lambda i: (0, 0)),
        ],
        out_specs=pl.BlockSpec((TILE_B, LANES), lambda i: (i, 0)),
        compiler_params=pltpu.CompilerParams(dimension_semantics=("parallel",)),
        cost_estimate=pl.CostEstimate(
            flops=flops,
            transcendentals=b * (D_GATE + N_TASK + LANES),
            bytes_accessed=bytes_accessed),
    )(x, wblob)


@jax.jit
def mmoe_forward(x_d, x_c, params):
    """x_d: [B, 25] int32 categorical ids, x_c: [B, X_C_DIM] float32."""
    offsets = jnp.asarray(EMB_OFFSETS, jnp.int32)
    flat_ids = x_d + offsets[None, :]                            # [B, 25]
    x_emb = params["emb_table"][flat_ids]                        # single gather -> [B, 25, 4]
    x = jnp.concatenate(
        [x_emb.reshape(x_d.shape[0], N_EMB * EMB_DIM), x_c.astype(jnp.float32)],
        axis=-1)                                                 # [B, 128]
    out = _dense_pallas(x, params["wblob"])                      # [B, 128] lane-dense
    # Match reference: list of n_task tensors of shape [B, 1].
    return [out[:, i:i + 1] for i in range(N_TASK)]


# --------------------------- parameter init -----------------------------------
def _linear_init(key, fan_in, fan_out):
    kw, kb = jax.random.split(key)
    bound = 1.0 / math.sqrt(fan_in)
    w = jax.random.uniform(kw, (fan_in, fan_out), jnp.float32, -bound, bound)
    b = jax.random.uniform(kb, (fan_out,), jnp.float32, -bound, bound)
    return w, b


def _block_diag(blocks):
    rows = sum(b.shape[0] for b in blocks)
    cols = sum(b.shape[1] for b in blocks)
    out = jnp.zeros((rows, cols), jnp.float32)                   # zero blocks exact in f32
    r = c = 0
    for b in blocks:
        out = out.at[r:r + b.shape[0], c:c + b.shape[1]].set(b)
        r += b.shape[0]
        c += b.shape[1]
    return out


def init_params(key):
    keys = iter(jax.random.split(key, 64))
    raw = {}

    # Combined embedding table (N(0,1), like nn.Embedding default), one blob.
    raw["emb_table"] = jax.random.normal(next(keys), (TOTAL_VOCAB, EMB_DIM), jnp.float32)

    raw["experts"] = []
    for _ in range(N_EXPERT):
        l1 = _linear_init(next(keys), FEATURE_DIM, EXPERT_HIDDEN[0])
        l2 = _linear_init(next(keys), EXPERT_HIDDEN[0], EXPERT_HIDDEN[1])
        l3 = _linear_init(next(keys), EXPERT_HIDDEN[1], EXPERT_DIM)
        raw["experts"].append((l1, l2, l3))

    raw["gates"] = [_linear_init(next(keys), FEATURE_DIM, N_EXPERT) for _ in range(N_TASK)]

    raw["towers"] = []
    for _ in range(N_TASK):
        l1 = _linear_init(next(keys), EXPERT_DIM, TOWER_HIDDEN[0])
        l2 = _linear_init(next(keys), TOWER_HIDDEN[0], TOWER_HIDDEN[1])
        l3 = _linear_init(next(keys), TOWER_HIDDEN[1], 1)
        raw["towers"].append((l1, l2, l3))

    # ---- fuse everything into the single lane-padded weight blob ----
    ew1 = jnp.concatenate([e[0][0] for e in raw["experts"]], axis=1)    # [128, 64]
    eb1 = jnp.concatenate([e[0][1] for e in raw["experts"]], axis=0)    # [64]
    ew2 = _block_diag([e[1][0] for e in raw["experts"]])                # [64, 32]
    eb2 = jnp.concatenate([e[1][1] for e in raw["experts"]], axis=0)    # [32]
    ew3 = _block_diag([e[2][0] for e in raw["experts"]])                # [32, 32]
    eb3 = jnp.concatenate([e[2][1] for e in raw["experts"]], axis=0)    # [32]

    gw = jnp.concatenate([g[0] for g in raw["gates"]], axis=1)          # [128, 8]
    gb = jnp.concatenate([g[1] for g in raw["gates"]], axis=0)          # [8]

    tw1 = _block_diag([t[0][0] for t in raw["towers"]])                 # [16, 16]
    tb1 = jnp.concatenate([t[0][1] for t in raw["towers"]], axis=0)     # [16]
    tw2 = _block_diag([t[1][0] for t in raw["towers"]])                 # [16, 8]
    tb2 = jnp.concatenate([t[1][1] for t in raw["towers"]], axis=0)     # [8]
    tw3 = _block_diag([t[2][0] for t in raw["towers"]])                 # [8, 2]
    tb3 = jnp.concatenate([t[2][1] for t in raw["towers"]], axis=0)     # [2]

    blob = jnp.zeros((BLOB_ROWS, LANES), jnp.float32)
    blob = blob.at[R_W1:R_W1 + FEATURE_DIM, 0:D_H1].set(ew1)
    blob = blob.at[R_W1:R_W1 + FEATURE_DIM, D_H1:D_H1 + D_GATE].set(gw)
    blob = blob.at[R_EW2:R_EW2 + D_H1, 0:D_H2].set(ew2)
    blob = blob.at[R_EW3:R_EW3 + D_H2, 0:D_H3].set(ew3)
    blob = blob.at[R_TW1:R_TW1 + D_T1, 0:D_T1].set(tw1)
    blob = blob.at[R_TW2:R_TW2 + D_T1, 0:D_T2].set(tw2)
    blob = blob.at[R_TW3:R_TW3 + D_T2, 0:N_TASK].set(tw3)
    blob = blob.at[R_B1, 0:D_H1].set(eb1)
    blob = blob.at[R_B1, D_H1:D_H1 + D_GATE].set(gb)
    blob = blob.at[R_EB2, 0:D_H2].set(eb2)
    blob = blob.at[R_EB3, 0:D_H3].set(eb3)
    blob = blob.at[R_TB1, 0:D_T1].set(tb1)
    blob = blob.at[R_TB2, 0:D_T2].set(tb2)
    blob = blob.at[R_TB3, 0:N_TASK].set(tb3)

    params = {"emb_table": raw["emb_table"], "wblob": blob}
    return params, raw


# ------------------------ plain-JAX reference (unfused) ------------------------
def mmoe_reference(x_d, x_c, raw):
    hi = jax.lax.Precision.HIGHEST
    pieces = []
    for i in range(N_EMB):
        tbl = raw["emb_table"][EMB_OFFSETS[i]:EMB_OFFSETS[i] + VOCAB_SIZES[i]]
        pieces.append(tbl[x_d[:, i]])
    x = jnp.concatenate(pieces + [x_c], axis=-1).astype(jnp.float32)

    expert_outs = []
    for (w1, b1), (w2, b2), (w3, b3) in raw["experts"]:
        h = jnp.maximum(jnp.dot(x, w1, precision=hi) + b1, 0.0)
        h = jnp.maximum(jnp.dot(h, w2, precision=hi) + b2, 0.0)
        h = jnp.maximum(jnp.dot(h, w3, precision=hi) + b3, 0.0)
        expert_outs.append(h)

    outs = []
    for t in range(N_TASK):
        gw, gb = raw["gates"][t]
        gate = jax.nn.softmax(jnp.dot(x, gw, precision=hi) + gb, axis=-1)
        mix = sum(gate[:, e:e + 1] * expert_outs[e] for e in range(N_EXPERT))
        (w1, b1), (w2, b2), (w3, b3) = raw["towers"][t]
        th = jnp.maximum(jnp.dot(mix, w1, precision=hi) + b1, 0.0)
        th = jnp.maximum(jnp.dot(th, w2, precision=hi) + b2, 0.0)
        outs.append(jax.nn.sigmoid(jnp.dot(th, w3, precision=hi) + b3))
    return outs


# --------------------------------- main ----------------------------------------
if __name__ == "__main__":
    root = jax.random.PRNGKey(0)
    k_params, k_xd, k_xc = jax.random.split(root, 3)

    params, raw = init_params(k_params)

    # Categorical inputs: one column per vocab table, values in [0, vocab_size).
    xd_keys = jax.random.split(k_xd, N_EMB)
    x_d = jnp.stack(
        [jax.random.randint(xd_keys[i], (BATCH,), 0, VOCAB_SIZES[i], dtype=jnp.int32)
         for i in range(N_EMB)], axis=1)                              # [B, 25] int32
    x_c = jax.random.normal(k_xc, (BATCH, X_C_DIM), jnp.float32)      # [B, 28]

    outputs = mmoe_forward(x_d, x_c, params)
    outputs = [jax.block_until_ready(o) for o in outputs]

    ref = mmoe_reference(x_d, x_c, raw)

    assert len(outputs) == N_TASK
    for o, r in zip(outputs, ref):
        assert o.shape == (BATCH, 1)
        assert bool(jnp.all(jnp.isfinite(o)))
        assert bool(jnp.all((o >= 0.0) & (o <= 1.0)))
        # Fused (block-diagonal, approx-reciprocal softmax) kernel vs unfused ref.
        assert bool(jnp.allclose(o, r, rtol=0.0, atol=5e-3))

    print("KERNEL_OK")
</pallas_src>

<mosaic_0001>
module attributes {stable_mosaic.version = 11 : i64} {
  func.func @mmoe_kernel(%arg0: i32, %arg1: memref<8x128xf32, #tpu.memory_space<vmem>>, %arg2: memref<272x128xf32, #tpu.memory_space<vmem>>, %arg3: memref<8x128xf32, #tpu.memory_space<vmem>>) attributes {dimension_semantics = [#tpu.dimension_semantics<parallel>], iteration_bounds = array<i64: 1>, scalar_prefetch = 0 : i64, scratch_operands = 0 : i64, tpu.core_type = #tpu.core_type<tc>, window_params = [{transform_indices = @transform_0, window_bounds = array<i64: 8, 128>}, {pipeline_mode = #tpu.pipeline_mode<synchronous>, transform_indices = @transform_1, window_bounds = array<i64: 272, 128>}, {transform_indices = @transform_2, window_bounds = array<i64: 8, 128>}]} {
    %c0 = arith.constant 0 : index
    %c0_0 = arith.constant 0 : index
    %0 = vector.load %arg1[%c0, %c0_0] : memref<8x128xf32, #tpu.memory_space<vmem>>, vector<8x128xf32>
    %c0_1 = arith.constant 0 : index
    %c0_2 = arith.constant 0 : index
    %1 = vector.load %arg2[%c0_1, %c0_2] : memref<272x128xf32, #tpu.memory_space<vmem>>, vector<128x128xf32>
    %cst = arith.constant dense<0.000000e+00> : vector<8x128xf32>
    %2 = tpu.matmul %0, %1, %cst {dimension_numbers = #tpu.dot_dimension_numbers<[1], [0], [0], [1], [0, 0, 1, 1], [], []>} : vector<8x128xf32>, vector<128x128xf32>, vector<8x128xf32> -> vector<8x128xf32>
    %c264 = arith.constant 264 : index
    %c0_3 = arith.constant 0 : index
    %3 = vector.load %arg2[%c264, %c0_3] : memref<272x128xf32, #tpu.memory_space<vmem>>, vector<1x128xf32>
    %4 = vector.broadcast %3 : vector<1x128xf32> to vector<8x128xf32>
    %5 = arith.addf %2, %4 : vector<8x128xf32>
    %6 = vector.extract_strided_slice %5 {offsets = [0, 0], sizes = [8, 64], strides = [1, 1]} : vector<8x128xf32> to vector<8x64xf32>
    %cst_4 = arith.constant 0.000000e+00 : f32
    %7 = vector.broadcast %cst_4 : f32 to vector<8x64xf32>
    %8 = arith.maximumf %6, %7 : vector<8x64xf32>
    %9 = vector.extract_strided_slice %5 {offsets = [0, 64], sizes = [8, 8], strides = [1, 1]} : vector<8x128xf32> to vector<8x8xf32>
    %c128 = arith.constant 128 : index
    %c0_5 = arith.constant 0 : index
    %10 = vector.load %arg2[%c128, %c0_5] : memref<272x128xf32, #tpu.memory_space<vmem>>, vector<64x32xf32>
    %cst_6 = arith.constant dense<0.000000e+00> : vector<8x32xf32>
    %11 = tpu.matmul %8, %10, %cst_6 {dimension_numbers = #tpu.dot_dimension_numbers<[1], [0], [0], [1], [0, 0, 1, 1], [], []>} : vector<8x64xf32>, vector<64x32xf32>, vector<8x32xf32> -> vector<8x32xf32>
    %c265 = arith.constant 265 : index
    %c0_7 = arith.constant 0 : index
    %12 = vector.load %arg2[%c265, %c0_7] : memref<272x128xf32, #tpu.memory_space<vmem>>, vector<1x32xf32>
    %13 = vector.broadcast %12 : vector<1x32xf32> to vector<8x32xf32>
    %14 = arith.addf %11, %13 : vector<8x32xf32>
    %cst_8 = arith.constant 0.000000e+00 : f32
    %15 = vector.broadcast %cst_8 : f32 to vector<8x32xf32>
    %16 = arith.maximumf %14, %15 : vector<8x32xf32>
    %c192 = arith.constant 192 : index
    %c0_9 = arith.constant 0 : index
    %17 = vector.load %arg2[%c192, %c0_9] : memref<272x128xf32, #tpu.memory_space<vmem>>, vector<32x32xf32>
    %cst_10 = arith.constant dense<0.000000e+00> : vector<8x32xf32>
    %18 = tpu.matmul %16, %17, %cst_10 {dimension_numbers = #tpu.dot_dimension_numbers<[1], [0], [0], [1], [0, 0, 1, 1], [], []>} : vector<8x32xf32>, vector<32x32xf32>, vector<8x32xf32> -> vector<8x32xf32>
    %c266 = arith.constant 266 : index
    %c0_11 = arith.constant 0 : index
    %19 = vector.load %arg2[%c266, %c0_11] : memref<272x128xf32, #tpu.memory_space<vmem>>, vector<1x32xf32>
    %20 = vector.broadcast %19 : vector<1x32xf32> to vector<8x32xf32>
    %21 = arith.addf %18, %20 : vector<8x32xf32>
    %cst_12 = arith.constant 0.000000e+00 : f32
    %22 = vector.broadcast %cst_12 : f32 to vector<8x32xf32>
    %23 = arith.maximumf %21, %22 : vector<8x32xf32>
    %24 = vector.extract_strided_slice %23 {offsets = [0, 0], sizes = [8, 8], strides = [1, 1]} : vector<8x32xf32> to vector<8x8xf32>
    %25 = vector.extract_strided_slice %23 {offsets = [0, 8], sizes = [8, 8], strides = [1, 1]} : vector<8x32xf32> to vector<8x8xf32>
    %26 = vector.extract_strided_slice %23 {offsets = [0, 16], sizes = [8, 8], strides = [1, 1]} : vector<8x32xf32> to vector<8x8xf32>
    %27 = vector.extract_strided_slice %23 {offsets = [0, 24], sizes = [8, 8], strides = [1, 1]} : vector<8x32xf32> to vector<8x8xf32>
    %28 = vector.extract_strided_slice %9 {offsets = [0, 0], sizes = [8, 4], strides = [1, 1]} : vector<8x8xf32> to vector<8x4xf32>
    %cst_13 = arith.constant dense<0xFF800000> : vector<8xf32>
    %29 = vector.multi_reduction <maximumf>, %28, %cst_13 [1] : vector<8x4xf32> to vector<8xf32>
    %30 = vector.shape_cast %29 : vector<8xf32> to vector<8x1xf32>
    %31 = vector.broadcast %30 : vector<8x1xf32> to vector<8x4xf32>
    %32 = arith.subf %28, %31 : vector<8x4xf32>
    %33 = math.exp %32 : vector<8x4xf32>
    %cst_14 = arith.constant dense<0.000000e+00> : vector<8xf32>
    %34 = vector.multi_reduction <add>, %33, %cst_14 [1] : vector<8x4xf32> to vector<8xf32>
    %35 = vector.shape_cast %34 : vector<8xf32> to vector<8x1xf32>
    %36 = tpu.reciprocal %35 {approx = true} : vector<8x1xf32> -> vector<8x1xf32>
    %37 = vector.broadcast %36 : vector<8x1xf32> to vector<8x4xf32>
    %38 = arith.mulf %33, %37 : vector<8x4xf32>
    %39 = vector.extract_strided_slice %38 {offsets = [0, 0], sizes = [8, 1], strides = [1, 1]} : vector<8x4xf32> to vector<8x1xf32>
    %40 = vector.broadcast %39 : vector<8x1xf32> to vector<8x8xf32>
    %41 = arith.mulf %40, %24 : vector<8x8xf32>
    %42 = vector.extract_strided_slice %38 {offsets = [0, 1], sizes = [8, 1], strides = [1, 1]} : vector<8x4xf32> to vector<8x1xf32>
    %43 = vector.broadcast %42 : vector<8x1xf32> to vector<8x8xf32>
    %44 = arith.mulf %43, %25 : vector<8x8xf32>
    %45 = arith.addf %41, %44 : vector<8x8xf32>
    %46 = vector.extract_strided_slice %38 {offsets = [0, 2], sizes = [8, 1], strides = [1, 1]} : vector<8x4xf32> to vector<8x1xf32>
    %47 = vector.broadcast %46 : vector<8x1xf32> to vector<8x8xf32>
    %48 = arith.mulf %47, %26 : vector<8x8xf32>
    %49 = arith.addf %45, %48 : vector<8x8xf32>
    %50 = vector.extract_strided_slice %38 {offsets = [0, 3], sizes = [8, 1], strides = [1, 1]} : vector<8x4xf32> to vector<8x1xf32>
    %51 = vector.broadcast %50 : vector<8x1xf32> to vector<8x8xf32>
    %52 = arith.mulf %51, %27 : vector<8x8xf32>
    %53 = arith.addf %49, %52 : vector<8x8xf32>
    %54 = vector.extract_strided_slice %9 {offsets = [0, 4], sizes = [8, 4], strides = [1, 1]} : vector<8x8xf32> to vector<8x4xf32>
    %cst_15 = arith.constant dense<0xFF800000> : vector<8xf32>
    %55 = vector.multi_reduction <maximumf>, %54, %cst_15 [1] : vector<8x4xf32> to vector<8xf32>
    %56 = vector.shape_cast %55 : vector<8xf32> to vector<8x1xf32>
    %57 = vector.broadcast %56 : vector<8x1xf32> to vector<8x4xf32>
    %58 = arith.subf %54, %57 : vector<8x4xf32>
    %59 = math.exp %58 : vector<8x4xf32>
    %cst_16 = arith.constant dense<0.000000e+00> : vector<8xf32>
    %60 = vector.multi_reduction <add>, %59, %cst_16 [1] : vector<8x4xf32> to vector<8xf32>
    %61 = vector.shape_cast %60 : vector<8xf32> to vector<8x1xf32>
    %62 = tpu.reciprocal %61 {approx = true} : vector<8x1xf32> -> vector<8x1xf32>
    %63 = vector.broadcast %62 : vector<8x1xf32> to vector<8x4xf32>
    %64 = arith.mulf %59, %63 : vector<8x4xf32>
    %65 = vector.extract_strided_slice %64 {offsets = [0, 0], sizes = [8, 1], strides = [1, 1]} : vector<8x4xf32> to vector<8x1xf32>
    %66 = vector.broadcast %65 : vector<8x1xf32> to vector<8x8xf32>
    %67 = arith.mulf %66, %24 : vector<8x8xf32>
    %68 = vector.extract_strided_slice %64 {offsets = [0, 1], sizes = [8, 1], strides = [1, 1]} : vector<8x4xf32> to vector<8x1xf32>
    %69 = vector.broadcast %68 : vector<8x1xf32> to vector<8x8xf32>
    %70 = arith.mulf %69, %25 : vector<8x8xf32>
    %71 = arith.addf %67, %70 : vector<8x8xf32>
    %72 = vector.extract_strided_slice %64 {offsets = [0, 2], sizes = [8, 1], strides = [1, 1]} : vector<8x4xf32> to vector<8x1xf32>
    %73 = vector.broadcast %72 : vector<8x1xf32> to vector<8x8xf32>
    %74 = arith.mulf %73, %26 : vector<8x8xf32>
    %75 = arith.addf %71, %74 : vector<8x8xf32>
    %76 = vector.extract_strided_slice %64 {offsets = [0, 3], sizes = [8, 1], strides = [1, 1]} : vector<8x4xf32> to vector<8x1xf32>
    %77 = vector.broadcast %76 : vector<8x1xf32> to vector<8x8xf32>
    %78 = arith.mulf %77, %27 : vector<8x8xf32>
    %79 = arith.addf %75, %78 : vector<8x8xf32>
    %80 = tpu.concatenate %53, %79 in 1 : vector<8x8xf32>, vector<8x8xf32> -> vector<8x16xf32>
    %c224 = arith.constant 224 : index
    %c0_17 = arith.constant 0 : index
    %81 = vector.load %arg2[%c224, %c0_17] : memref<272x128xf32, #tpu.memory_space<vmem>>, vector<16x16xf32>
    %cst_18 = arith.constant dense<0.000000e+00> : vector<8x16xf32>
    %82 = tpu.matmul %80, %81, %cst_18 {dimension_numbers = #tpu.dot_dimension_numbers<[1], [0], [0], [1], [0, 0, 1, 1], [], []>} : vector<8x16xf32>, vector<16x16xf32>, vector<8x16xf32> -> vector<8x16xf32>
    %c267 = arith.constant 267 : index
    %c0_19 = arith.constant 0 : index
    %83 = vector.load %arg2[%c267, %c0_19] : memref<272x128xf32, #tpu.memory_space<vmem>>, vector<1x16xf32>
    %84 = vector.broadcast %83 : vector<1x16xf32> to vector<8x16xf32>
    %85 = arith.addf %82, %84 : vector<8x16xf32>
    %cst_20 = arith.constant 0.000000e+00 : f32
    %86 = vector.broadcast %cst_20 : f32 to vector<8x16xf32>
    %87 = arith.maximumf %85, %86 : vector<8x16xf32>
    %c240 = arith.constant 240 : index
    %c0_21 = arith.constant 0 : index
    %88 = vector.load %arg2[%c240, %c0_21] : memref<272x128xf32, #tpu.memory_space<vmem>>, vector<16x8xf32>
    %cst_22 = arith.constant dense<0.000000e+00> : vector<8x8xf32>
    %89 = tpu.matmul %87, %88, %cst_22 {dimension_numbers = #tpu.dot_dimension_numbers<[1], [0], [0], [1], [0, 0, 1, 1], [], []>} : vector<8x16xf32>, vector<16x8xf32>, vector<8x8xf32> -> vector<8x8xf32>
    %c268 = arith.constant 268 : index
    %c0_23 = arith.constant 0 : index
    %90 = vector.load %arg2[%c268, %c0_23] : memref<272x128xf32, #tpu.memory_space<vmem>>, vector<1x8xf32>
    %91 = vector.broadcast %90 : vector<1x8xf32> to vector<8x8xf32>
    %92 = arith.addf %89, %91 : vector<8x8xf32>
    %cst_24 = arith.constant 0.000000e+00 : f32
    %93 = vector.broadcast %cst_24 : f32 to vector<8x8xf32>
    %94 = arith.maximumf %92, %93 : vector<8x8xf32>
    %c256 = arith.constant 256 : index
    %c0_25 = arith.constant 0 : index
    %95 = vector.load %arg2[%c256, %c0_25] : memref<272x128xf32, #tpu.memory_space<vmem>>, vector<8x128xf32>
    %cst_26 = arith.constant dense<0.000000e+00> : vector<8x128xf32>
    %96 = tpu.matmul %94, %95, %cst_26 {dimension_numbers = #tpu.dot_dimension_numbers<[1], [0], [0], [1], [0, 0, 1, 1], [], []>} : vector<8x8xf32>, vector<8x128xf32>, vector<8x128xf32> -> vector<8x128xf32>
    %c269 = arith.constant 269 : index
    %c0_27 = arith.constant 0 : index
    %97 = vector.load %arg2[%c269, %c0_27] : memref<272x128xf32, #tpu.memory_space<vmem>>, vector<1x128xf32>
    %98 = vector.broadcast %97 : vector<1x128xf32> to vector<8x128xf32>
    %99 = arith.addf %96, %98 : vector<8x128xf32>
    %100 = arith.negf %99 : vector<8x128xf32>
    %101 = math.exp %100 : vector<8x128xf32>
    %cst_28 = arith.constant 1.000000e+00 : f32
    %102 = vector.broadcast %cst_28 : f32 to vector<8x128xf32>
    %103 = arith.addf %102, %101 : vector<8x128xf32>
    %104 = arith.divf %102, %103 : vector<8x128xf32>
    %c0_29 = arith.constant 0 : index
    %c0_30 = arith.constant 0 : index
    %105 = vector.load %arg3[%c0_29, %c0_30] : memref<8x128xf32, #tpu.memory_space<vmem>>, vector<8x128xf32>
    tpu.vector_store %arg3[%c0_29, %c0_30], %104 {strides = array<i32>} : memref<8x128xf32, #tpu.memory_space<vmem>>, vector<8x128xf32>,
    return
  }
  func.func @transform_0(%arg0: i32) -> (i32, i32) {
    %c0_i32 = arith.constant 0 : i32
    %c0_i32_0 = arith.constant 0 : i32
    return %arg0, %c0_i32 : i32, i32
  }
  func.func @transform_1(%arg0: i32) -> (i32, i32) {
    %c0_i32 = arith.constant 0 : i32
    %c0_i32_0 = arith.constant 0 : i32
    %c0_i32_1 = arith.constant 0 : i32
    return %c0_i32, %c0_i32_0 : i32, i32
  }
  func.func @transform_2(%arg0: i32) -> (i32, i32) {
    %c0_i32 = arith.constant 0 : i32
    %c0_i32_0 = arith.constant 0 : i32
    return %arg0, %c0_i32 : i32, i32
  }
}

</mosaic_0001>

<bundles_post_ra>
// kernel: mmoe_forward.1
= control target key start
LH: loop header
LB: loop body
LE: loop exit
PB: predicated region body
PF: predicated region fallthrough
CT: control target
= control target key end

     0   :  { %v861_v0 = vmov 0.0|0.0   ;;  %vm862_vm0 = vmmov 0   ;;  %v863_v4 = vmov 0.0   ;;  %vm329_vm1 = vcmask 589344   ;;  %s864_s12 = smov 60   ;;  %s865_s13 = smov 64   ;;  %s1047_s1 = inlined_call_operand.vmem [shape: f32[272,128], index: 1, kind: input, shape index: {}]   ;;  %s1048_s0 = inlined_call_operand.vmem [shape: f32[8,128], index: 0, kind: input, shape index: {}]   ;;  %s1049_s2 = inlined_call_operand.vmem [shape: f32[8,128], index: 2, kind: output, shape index: {}]  }
   0x1   :  { %775 = vmatprep.subr.bf16.mxu0 %v861_v0  ;;  %v12_v1 = vld [vmem:[%s1047_s1] sm:$0xff]  ;;  %v13_v2 = vld [vmem:[%s1047_s1 + $0x8] sm:$0xff]  ;;  %v14_v3 = vld [vmem:[%s1047_s1 + $0x10] sm:$0xff]  ;;  %723 = vmatprep.mubr.msk.f32.mxu0 %vm862_vm0, %v863_v4  ;;  %vm117_vm2 = vcmask 523264   ;;  %vm276_vm3 = vcmask 556544   ;;  %vm201_vm4 = vcmask 261120  }
   0x2   :  { %v776_v5 = vpack.c.bf16 %v13_v2, %v12_v1  ;;  %v15_v6 = vld [vmem:[%s1047_s1 + $0x18] sm:$0xff]  ;;  %799 = vmatprep.subr.bf16.mxu1 %v861_v0  ;;  %742 = vmatprep.mubr.msk.f32.mxu1 %vm862_vm0, %v863_v4  ;;  %v16_v8 = vld [vmem:[%s1047_s1 + $0x20] sm:$0xff]  ;;  %v17_v9 = vld [vmem:[%s1047_s1 + $0x28] sm:$0xff]  ;;  %vm287_vm5 = vcmask 31744   ;;  %s874_s18 = smov 112   ;;  %s875_s19 = smov 120  }
   0x3   :  { %v779_v7 = vpack.c.bf16 %v15_v6, %v14_v3  ;;  %v104_v10 = vld [vmem:[%s1047_s1 + $0x80] sm:$0xff]  ;;  %v105_v11 = vld [vmem:[%s1047_s1 + $0x88] sm:$0xff]  ;;  %v106_v12 = vld [vmem:[%s1047_s1 + $0x90] sm:$0xff]  ;;  %v782_v14 = vpack.c.bf16 %v17_v9, %v16_v8  ;;  %v867_v8 = vmov 69   ;;  %s876_s20 = smov 104   ;;  %s877_s25 = smov 8  }
   0x4   :  { %777 = vmatpush3.bf16.msra.mxu0 %v776_v5  ;;  %v107_v13 = vld [vmem:[%s1047_s1 + $0x98] sm:$0xff]  ;;  %v800_v15 = vpack.c.bf16 %v105_v11, %v104_v10  ;;  %v18_v16 = vld [vmem:[%s1047_s1 + $0x30] sm:$0xff]  ;;  %v108_v19 = vld [vmem:[%s1047_s1 + $0xa0] sm:$0xff]  ;;  %840 = vset.pattern.permute.xlu0 %v867_v8  ;;  %vm385_vm6 = vcmask 64512   ;;  %vm394_vm7 = vcmask 130048  }
   0x5   :  { %778 = vmatprep.subr.bf16.mxu0 %v861_v0  ;;  %v19_v17 = vld [vmem:[%s1047_s1 + $0x38] sm:$0xff]  ;;  %v803_v18 = vpack.c.bf16 %v107_v13, %v106_v12  ;;  %v109_v20 = vld [vmem:[%s1047_s1 + $0xa8] sm:$0xff]  ;;  %v20_v22 = vld [vmem:[%s1047_s1 + $0x40] sm:$0xff] }
   0x6   :  { %801 = vmatpush3.bf16.msra.mxu1 %v800_v15  ;;  %v785_v21 = vpack.c.bf16 %v19_v17, %v18_v16  ;;  %v21_v23 = vld [vmem:[%s1047_s1 + $0x48] sm:$0xff]  ;;  %v806_v24 = vpack.c.bf16 %v109_v20, %v108_v19  ;;  %v22_v26 = vld [vmem:[%s1047_s1 + $0x50] sm:$0xff]  ;;  %v23_v27 = vld [vmem:[%s1047_s1 + $0x58] sm:$0xff]  ;;  %v868_v17 = vmov 65   ;;  %v870_v19 = vmov 66  }
   0x7   :  { %802 = vmatprep.subr.bf16.mxu1 %v861_v0  ;;  %v788_v25 = vpack.c.bf16 %v21_v23, %v20_v22  ;;  %v791_v28 = vpack.c.bf16 %v23_v27, %v22_v26  ;;  %v24_v29 = vld [vmem:[%s1047_s1 + $0x60] sm:$0xff]  ;;  %v25_v30 = vld [vmem:[%s1047_s1 + $0x68] sm:$0xff]  ;;  %v26_v32 = vld [vmem:[%s1047_s1 + $0x70] sm:$0xff]  ;;  %v871_v20 = vmov 68   ;;  %v873_v22 = vmov 64  }
   0x8   :  { %780 = vmatpush3.bf16.msra.mxu0 %v779_v7  ;;  %v794_v31 = vpack.c.bf16 %v25_v30, %v24_v29  ;;  %v27_v33 = vld [vmem:[%s1047_s1 + $0x78] sm:$0xff]  ;;  %v11_v35 = vld [vmem:[%s1048_s0] sm:$0xff]  ;;  %v110_v36 = vld [vmem:[%s1047_s1 + $0xb0] sm:$0xff]  ;;  %v866_v7 = vmov 70  }
   0x9   :  { %781 = vmatprep.subr.bf16.mxu0 %v861_v0  ;;  %v797_v34 = vpack.c.bf16 %v27_v33, %v26_v32  ;;  %v111_v37 = vld [vmem:[%s1047_s1 + $0xb8] sm:$0xff]  ;;  %v640_v39 = vld [vmem:[%s1047_s1 + $0x108] ss:$0 sm:$0xff]  ;;  %v192_v46 = vld [vmem:[%s1047_s1 + $0xc0] sm:$0xff]  ;;  %841 = vset.pattern.permute.xlu1 %v866_v7 }
   0xa   :  { %804 = vmatpush3.bf16.msra.mxu1 %v803_v18  ;;  %v809_v38 = vpack.c.bf16 %v111_v37, %v110_v36  ;;  %v193_v47 = vld [vmem:[%s1047_s1 + $0xc8] sm:$0xff]  ;;  %v194_v49 = vld [vmem:[%s1047_s1 + $0xd0] sm:$0xff]  ;;  %v195_v50 = vld [vmem:[%s1047_s1 + $0xd8] sm:$0xff]  ;;  %v869_v18 = vmov 71  }
   0xb   :  { %805 = vmatprep.subr.bf16.mxu1 %v861_v0  ;;  %v812_v48 = vpack.c.bf16 %v193_v47, %v192_v46  ;;  %v815_v51 = vpack.c.bf16 %v195_v50, %v194_v49  ;;  %v641_v60 = vld [vmem:[%s1047_s1 + $0x109] ss:$0 sm:$0xff]  ;;  %v643_v23 = vld [vmem:[%s1047_s1 + $0x10a] ss:$0 sm:$0xff]  ;;  %v387_v36 = vld [vmem:[%s1047_s1 + $0xe0] sm:$0xff] }
   0xc   :  { %783 = vmatpush3.bf16.msra.mxu0 %v782_v14  ;;  %v388_v37 = vld [vmem:[%s1047_s1 + $0xe8] sm:$0xff] }
   0xd   :  { %784 = vmatprep.subr.bf16.mxu0 %v861_v0 }
   0xe   :  { %807 = vmatpush3.bf16.msra.mxu1 %v806_v24 }
   0xf   :  { %808 = vmatprep.subr.bf16.mxu1 %v861_v0 }
  0x10   :  { %786 = vmatpush3.bf16.msra.mxu0 %v785_v21  ;;  %v872_v21 = vmov 67  }
  0x11   :  { %787 = vmatprep.subr.bf16.mxu0 %v861_v0 }
  0x12   :  { %810 = vmatpush3.bf16.msra.mxu1 %v809_v38  ;;  %v818_v38 = vpack.c.bf16 %v388_v37, %v387_v36 }
  0x13   :  { %811 = vmatprep.subr.bf16.mxu1 %v861_v0 }
  0x14   :  { %789 = vmatpush3.bf16.msra.mxu0 %v788_v25 }
  0x15   :  { %790 = vmatprep.subr.bf16.mxu0 %v861_v0 }
  0x18   :  { %792 = vmatpush3.bf16.msra.mxu0 %v791_v28 }
  0x19   :  { %793 = vmatprep.subr.bf16.mxu0 %v861_v0 }
  0x1c   :  { %795 = vmatpush3.bf16.msra.mxu0 %v794_v31 }
  0x1d   :  { %796 = vmatprep.subr.bf16.mxu0 %v861_v0 }
  0x20   :  { %798 = vmatpush3.bf16.msra.mxu0 %v797_v34 }
  0x21   :  { %770 = vmatprep.subr.mxu0 %v863_v4 }
  0x23   :  { %724 = vmatmul.mubr.f32.vlgmr.msra.gmra.mrb[0].mxu0 %v11_v35 }
  0x24   :  { %772 = vmatprep.mubr.msk.f32.mxu0 %vm862_vm0, %v863_v4 }
  0xf6   :  { %v99_v40 = vpop.f32.mrb[0].mxu0 }
  0xf7   :  { %v100_v41 = vadd.f32 %v640_v39, %v99_v40  ;;  %v725_v42 = vpop.f32.mrb[1].mxu0 }
  0xf9   :  { %v330_v43 = vsel %vm329_vm1, %v100_v41, -inf  ;;  %v103_v44 = vmax.f32 %v100_v41, 0.0  ;;  %v277_v45 = vsel %vm276_vm3, %v100_v41, -inf }
  0xfa   :  { %331 = vmax.xlane.f32.xlu0 %v330_v43 }
  0xfb   :  { %743 = vmatmul.mubr.msk.f32.vlgmr.msra.gmra.mrb[0].mxu1 %vm117_vm2, %v103_v44 }
  0xfc   :  { %753 = vmatprep.mubr.msk.f32.mxu1 %vm862_vm0, %v863_v4  ;;  %813 = vmatpush3.bf16.msra.mxu1 %v812_v48 }
  0xfd   :  { %814 = vmatprep.subr.bf16.mxu1 %v861_v0 }
  0xfe   :  { %278 = vmax.xlane.f32.xlu0 %v277_v45 }
 0x100   :  { %816 = vmatpush3.bf16.msra.mxu1 %v815_v51 }
 0x101   :  { %817 = vmatprep.subr.bf16.mxu1 %v861_v0 }
 0x187   :  { %v332_v52 = vpop.xlane.xlu0 %331 }
 0x188   :  { %v333_v53 = vsub.f32 %v100_v41, %v332_v52 }
 0x18a   :  { %v334_v54 = vmul.f32 1.442695, %v333_v53 }
 0x18b   :  { %v279_v55 = vpop.xlane.xlu0 %278 }
 0x18c   :  { %849 = vpow2.f32 %v334_v54  ;;  %v280_v56 = vsub.f32 %v100_v41, %v279_v55 }
 0x18e   :  { %v281_v57 = vmul.f32 1.442695, %v280_v56 }
 0x190   :  { %851 = vpow2.f32 %v281_v57 }
 0x196   :  { %v850_v58 = vpop.eup %849 }
 0x197   :  { %337 = vrot.lane.b32.xlu1 %v850_v58, %s864_s12 }
 0x19a   :  { %v852_v59 = vpop.eup %851 }
 0x19b   :  { %284 = vrot.lane.b32.xlu1 %v852_v59, %s865_s13 }
 0x1ce   :  { %v187_v61 = vpop.f32.mrb[0].mxu1 }
 0x1cf   :  { %v188_v62 = vadd.f32 %v641_v60, %v187_v61  ;;  %v744_v63 = vpop.f32.mrb[1].mxu1  ;;  %v645_v61 = vld [vmem:[%s1047_s1 + $0x10b] ss:$0 sm:$0xff] }
 0x1d1   :  { %v191_v1 = vmax.f32 %v188_v62, 0.0 }
 0x1d3   :  { %754 = vmatmul.mubr.msk.f32.vlgmr.msra.gmra.mrb[2].mxu1 %vm201_vm4, %v191_v1 }
 0x1d4   :  { %760 = vmatprep.mubr.msk.f32.mxu1 %vm862_vm0, %v863_v4  ;;  %819 = vmatpush3.bf16.msra.mxu1 %v818_v38 }
 0x1d5   :  { %820 = vmatprep.subr.bf16.mxu1 %v861_v0 }
 0x209   :  { %v338_v2 = vpop.permute.xlu1 %337 }
 0x20a   :  { %v340_v3 = vsel %vm287_vm5, %v338_v2, 0.0 }
 0x20b   :  { %341 = vadd.xlane.f32.xlu0 %v340_v3  ;;  %v647_v3 = vld [vmem:[%s1047_s1 + $0x10c] ss:$0 sm:$0xff] }
 0x20d   :  { %v285_v5 = vpop.permute.xlu1 %284 }
 0x20e   :  { %v288_v6 = vsel %vm287_vm5, %v285_v5, 0.0 }
 0x20f   :  { %289 = vadd.xlane.f32.xlu1 %v288_v6 }
 0x298   :  { %v342_v9 = vpop.xlane.xlu0 %341 }
 0x299   :  { %853 = vrcp.f32 %v342_v9  ;;  %v649_v9 = vld [vmem:[%s1047_s1 + $0x10d] ss:$0 sm:$0xff] }
 0x29c   :  { %v290_v10 = vpop.xlane.xlu1 %289 }
 0x29d   :  { %855 = vrcp.f32 %v290_v10 }
 0x2a3   :  { %v854_v11 = vpop.eup %853 }
 0x2a4   :  { %v344_v12 = vmul.f32 %v854_v11, %v850_v58  ;;  %v469_v58 = vld [vmem:[%s1047_s1 + $0xf0] sm:$0xff] }
 0x2a6   :  { %362 = vperm.xlu1 %841, %v344_v12   ;;  %352 = vperm.xlu0 %840, %v344_v12   ;;  %v271_v13 = vpop.f32.mrb[2].mxu1 }
 0x2a7   :  { %v856_v14 = vpop.eup %855  ;;  %v755_v15 = vpop.f32.mrb[3].mxu1  ;;  %v272_v24 = vadd.f32 %v643_v23, %v271_v13 }
 0x2a8   :  { %v292_v16 = vmul.f32 %v856_v14, %v852_v59  ;;  %v470_v59 = vld [vmem:[%s1047_s1 + $0xf8] sm:$0xff] }
 0x2a9   :  { %v275_v25 = vmax.f32 %v272_v24, 0.0  ;;  %v821_v60 = vpack.c.bf16 %v470_v59, %v469_v58 }
 0x2aa   :  { %843 = vset.pattern.permute.xlu1 %v868_v17  ;;  %842 = vset.pattern.permute.xlu0 %v869_v18 }
 0x2ab   :  { %300 = vperm.xlu1 %843, %v292_v16   ;;  %372 = vperm.xlu0 %842, %v344_v12  }
 0x2af   :  { %845 = vset.pattern.permute.xlu1 %v870_v19  ;;  %844 = vset.pattern.permute.xlu0 %v871_v20 }
 0x2b0   :  { %310 = vperm.xlu1 %845, %v292_v16   ;;  %347 = vperm.xlu0 %844, %v344_v12  }
 0x2b4   :  { %846 = vset.pattern.permute.xlu1 %v872_v21  ;;  %848 = vset.pattern.permute.xlu0 %v869_v18 }
 0x2b5   :  { %320 = vperm.xlu1 %846, %v292_v16  }
 0x2b9   :  { %847 = vset.pattern.permute.xlu1 %v873_v22 }
 0x325   :  { %v363_v26 = vpop.permute.xlu1 %362  ;;  %v353_v27 = vpop.permute.xlu0 %352 }
 0x326   :  { %v365_v28 = vmul.f32 %v363_v26, %v275_v25  ;;  %v355_v29 = vmul.f32 %v353_v27, %v275_v25 }
 0x328   :  { %367 = vrot.lane.b32.xlu1 %v365_v28, %s874_s18  ;;  %357 = vrot.lane.b32.xlu0 %v355_v29, %s875_s19 }
 0x32a   :  { %v301_v30 = vpop.permute.xlu1 %300  ;;  %v373_v31 = vpop.permute.xlu0 %372 }
 0x32b   :  { %v375_v32 = vmul.f32 %v373_v31, %v275_v25  ;;  %v303_v33 = vmul.f32 %v301_v30, %v275_v25 }
 0x32c   :  { %295 = vperm.xlu1 %847, %v292_v16  }
 0x32d   :  { %377 = vrot.lane.b32.xlu0 %v375_v32, %s876_s20 }
 0x32f   :  { %v311_v34 = vpop.permute.xlu1 %310  ;;  %v348_v41 = vpop.permute.xlu0 %347 }
 0x330   :  { %v313_v35 = vmul.f32 %v311_v34, %v275_v25  ;;  %v350_v42 = vmul.f32 %v348_v41, %v275_v25 }
 0x331   :  { %305 = vrot.lane.b32.xlu0 %v303_v33, %s875_s19 }
 0x332   :  { %315 = vrot.lane.b32.xlu1 %v313_v35, %s874_s18 }
 0x334   :  { %v321_v39 = vpop.permute.xlu1 %320 }
 0x335   :  { %v323_v40 = vmul.f32 %v321_v39, %v275_v25 }
 0x337   :  { %325 = vrot.lane.b32.xlu0 %v323_v40, %s876_s20 }
 0x39a   :  { %v358_v43 = vpop.permute.xlu0 %357  ;;  %v368_v45 = vpop.permute.xlu1 %367 }
 0x39b   :  { %v360_v44 = vadd.f32 %v358_v43, %v350_v42 }
 0x39d   :  { %v370_v46 = vadd.f32 %v368_v45, %v360_v44 }
 0x39f   :  { %v378_v47 = vpop.permute.xlu0 %377 }
 0x3a0   :  { %v380_v48 = vadd.f32 %v378_v47, %v370_v46 }
 0x3a2   :  { %382 = vrot.lane.b32.xlu1 %v380_v48, %s877_s25 }
 0x3a3   :  { %v306_v51 = vpop.permute.xlu0 %305 }
 0x3a9   :  { %v326_v55 = vpop.permute.xlu0 %325 }
 0x3ab   :  { %v296_v49 = vpop.permute.xlu1 %295 }
 0x3ac   :  { %v298_v50 = vmul.f32 %v296_v49, %v275_v25 }
 0x3ae   :  { %v308_v52 = vadd.f32 %v306_v51, %v298_v50 }
 0x3af   :  { %v316_v53 = vpop.permute.xlu1 %315 }
 0x3b0   :  { %v318_v54 = vadd.f32 %v316_v53, %v308_v52 }
 0x3b2   :  { %v328_v0 = vadd.f32 %v326_v55, %v318_v54 }
 0x414   :  { %v383_v56 = vpop.permute.xlu1 %382 }
 0x415   :  { %v386_v57 = vsel %vm385_vm6, %v328_v0, %v383_v56 }
 0x416   :  { %761 = vmatmul.mubr.msk.f32.vlgmr.msra.gmra.mrb[4].mxu1 %vm394_vm7, %v386_v57 }
 0x417   :  { %767 = vmatprep.mubr.msk.f32.mxu1 %vm862_vm0, %v863_v4  ;;  %822 = vmatpush3.bf16.msra.mxu1 %v821_v60  ;;  %v550_v4 = vld [vmem:[%s1047_s1 + $0x100] sm:$0xff] }
 0x418   :  { %771 = vmatpush3.msra.mxu0 %v550_v4 }
 0x4e9   :  { %v464_v62 = vpop.f32.mrb[4].mxu1 }
 0x4ea   :  { %v465_v63 = vadd.f32 %v645_v61, %v464_v62  ;;  %v762_v1 = vpop.f32.mrb[5].mxu1 }
 0x4ec   :  { %v468_v2 = vmax.f32 %v465_v63, 0.0 }
 0x4ee   :  { %768 = vmatmul.mubr.msk.f32.vlgmr.msra.gmra.mrb[6].mxu1 %vm394_vm7, %v468_v2 }
 0x5c1   :  { %v545_v5 = vpop.f32.mrb[6].mxu1 }
 0x5c2   :  { %v546_v6 = vadd.f32 %v647_v3, %v545_v5  ;;  %v769_v7 = vpop.f32.mrb[7].mxu1 }
 0x5c4   :  { %v549_v8 = vmax.f32 %v546_v6, 0.0 }
 0x5c6   :  { %773 = vmatmul.mubr.msk.f32.vlgmr.msra.gmra.mrb[2].mxu0 %vm385_vm6, %v549_v8 }
 0x699   :  { %v625_v10 = vpop.f32.mrb[2].mxu0 }
 0x69a   :  { %v626_v11 = vadd.f32 %v649_v9, %v625_v10  ;;  %v774_v12 = vpop.f32.mrb[3].mxu0 }
 0x69c   :  { %v651_v13 = vmul.f32 -1.442695, %v626_v11 }
 0x69e   :  { %857 = vpow2.f32 %v651_v13 }
 0x6a8   :  { %v858_v14 = vpop.eup %857 }
 0x6a9   :  { %v632_v15 = vadd.f32 1.0, %v858_v14 }
 0x6ab   :  { %859 = vrcp.f32 %v632_v15 }
 0x6b5   :  { %v860_v16 = vpop.eup %859 }
 0x6b6   :  { %635 = vst [vmem:[%s1049_s2] sm:$0xff] %v860_v16 }

</bundles_post_ra>
